<compile_context>
chip_gen: v7x
topology: tpu7x:2x2x1
jax: 0.10.0
libtpu: 0.0.40
codegen_flags: <defaults>
</compile_context>

<pallas_src>
import functools

import jax
import jax.numpy as jnp
from jax.experimental import pallas as pl
from jax.experimental.pallas import tpu as pltpu

_NUM_SPLITS = 2  # leading "parallel" grid axis (v7x megacore); harmless elsewhere


def _round_up(x, m):
    return (x + m - 1) // m * m


def _occupancy_loss_kernel(g_ref, y_ref, w_ref, out_ref, acc_ref, *, inv_count):
    t = pl.program_id(1)

    @pl.when(t == 0)
    def _():
        acc_ref[...] = jnp.zeros_like(acc_ref)

    # Hot path: sublane max over primitives + BCE-with-logits, all lane-dense.
    g = g_ref[...].astype(jnp.float32)                 # [P, L]
    x = jnp.max(g, axis=0, keepdims=True)              # [1, L]   (Gunion)
    y = y_ref[...].astype(jnp.float32)                 # [1, L]
    w = w_ref[...].astype(jnp.float32)                 # [1, L]

    # Numerically stable BCE with logits (matches torch's formulation).
    per_elem = jnp.maximum(x, 0.0) - x * y + jnp.log1p(jnp.exp(-jnp.abs(x)))
    # Vector accumulate; no per-step cross-lane reduce / SMEM scalar RMW.
    acc_ref[...] += w * per_elem

    @pl.when(t == pl.num_programs(1) - 1)
    def _():
        partial = jnp.sum(acc_ref[...]) * inv_count
        out_ref[...] = jnp.full(out_ref.shape, partial, jnp.float32)


def occupancy_loss(G, labels, weights, *, col_tile=65536):
    """G: [B, N, P] float; labels, weights: [B, N] float. Returns scalar f32."""
    B, N, P = G.shape
    R = B * N

    # Lane-dense layouts: rows -> lanes.
    gT = jnp.transpose(G.reshape(R, P))                # [P, R]
    y2 = labels.reshape(1, R)
    w2 = weights.reshape(1, R)

    # Column tile (multiple of 128), capped by the 128-rounded row count.
    L = min(_round_up(col_tile, 128), _round_up(R, 128))
    Rp = _round_up(R, _NUM_SPLITS * L)
    if Rp != R:
        pad = Rp - R
        gT = jnp.pad(gT, ((0, 0), (0, pad)))           # padded logits -> 0
        y2 = jnp.pad(y2, ((0, 0), (0, pad)))           # padded labels -> 0
        w2 = jnp.pad(w2, ((0, 0), (0, pad)))           # padded weights -> 0
                                                       # (zero contribution; the
                                                       # mean uses the true R)

    T = Rp // (_NUM_SPLITS * L)                        # tiles per split
    kernel = functools.partial(_occupancy_loss_kernel, inv_count=1.0 / float(R))

    col_map = lambda c, t: (0, c * T + t)
    out = pl.pallas_call(
        kernel,
        out_shape=jax.ShapeDtypeStruct((8, _NUM_SPLITS * 128), jnp.float32),
        grid_spec=pltpu.PrefetchScalarGridSpec(
            num_scalar_prefetch=0,
            grid=(_NUM_SPLITS, T),
            in_specs=[
                pl.BlockSpec((P, L), col_map),
                pl.BlockSpec((1, L), col_map),
                pl.BlockSpec((1, L), col_map),
            ],
            out_specs=pl.BlockSpec((8, 128), lambda c, t: (0, c)),
            scratch_shapes=[pltpu.VMEM((1, L), jnp.float32)],
        ),
        compiler_params=pltpu.CompilerParams(
            dimension_semantics=("parallel", "arbitrary")),
    )(gT, y2, w2)
    # Each split broadcast its (already 1/R-scaled) partial over an (8,128)
    # block; pick lane 0 of each block and sum the partials.
    return jnp.sum(out[0, ::128])


def occupancy_loss_ref(G, labels, weights):
    x = jnp.max(G.astype(jnp.float32), axis=-1)
    y = labels.astype(jnp.float32)
    w = weights.astype(jnp.float32)
    per = jnp.maximum(x, 0.0) - x * y + jnp.log1p(jnp.exp(-jnp.abs(x)))
    return jnp.mean(w * per)


if __name__ == "__main__":
    key = jax.random.PRNGKey(0)
    kg, kl, kw = jax.random.split(key, 3)

    B, N, P = 2, 128, 8  # batch, sample points, superquadric primitives
    G = jax.random.normal(kg, (B, N, P), dtype=jnp.float32) * 2.0
    labels = (jax.random.uniform(kl, (B, N)) > 0.5).astype(jnp.float32)
    weights = jax.random.uniform(kw, (B, N), minval=0.5, maxval=1.5).astype(jnp.float32)

    loss = occupancy_loss(G, labels, weights)
    loss = jax.block_until_ready(loss)

    ref = occupancy_loss_ref(G, labels, weights)
    assert jnp.allclose(loss, ref, rtol=1e-5, atol=1e-5), (loss, ref)

    print("KERNEL_OK")
</pallas_src>

<mosaic_0001>
module attributes {stable_mosaic.version = 11 : i64} {
  func.func @_occupancy_loss_kernel(%arg0: i32, %arg1: i32, %arg2: memref<8x256xf32, #tpu.memory_space<vmem>>, %arg3: memref<1x256xf32, #tpu.memory_space<vmem>>, %arg4: memref<1x256xf32, #tpu.memory_space<vmem>>, %arg5: memref<8x128xf32, #tpu.memory_space<vmem>>, %arg6: memref<1x256xf32, #tpu.memory_space<vmem>>) attributes {dimension_semantics = [#tpu.dimension_semantics<parallel>, #tpu.dimension_semantics<arbitrary>], iteration_bounds = array<i64: 2, 1>, scalar_prefetch = 0 : i64, scratch_operands = 1 : i64, tpu.core_type = #tpu.core_type<tc>, window_params = [{transform_indices = @transform_0, window_bounds = array<i64: 8, 256>}, {transform_indices = @transform_1, window_bounds = array<i64: 1, 256>}, {transform_indices = @transform_2, window_bounds = array<i64: 1, 256>}, {transform_indices = @transform_3, window_bounds = array<i64: 8, 128>}]} {
    %c0_i32 = arith.constant 0 : i32
    %0 = arith.cmpi eq, %arg1, %c0_i32 : i32
    %1 = arith.extui %0 : i1 to i32
    %c0_i32_0 = arith.constant 0 : i32
    %2 = arith.cmpi ne, %1, %c0_i32_0 : i32
    scf.if %2 {
      %cst_14 = arith.constant 0.000000e+00 : f32
      %25 = vector.broadcast %cst_14 : f32 to vector<1x256xf32>
      %c0_15 = arith.constant 0 : index
      %c0_16 = arith.constant 0 : index
      %26 = vector.load %arg6[%c0_15, %c0_16] : memref<1x256xf32, #tpu.memory_space<vmem>>, vector<1x256xf32>
      tpu.vector_store %arg6[%c0_15, %c0_16], %25 {strides = array<i32>} : memref<1x256xf32, #tpu.memory_space<vmem>>, vector<1x256xf32>,
    } else {
    }
    %c0 = arith.constant 0 : index
    %c0_1 = arith.constant 0 : index
    %3 = vector.load %arg2[%c0, %c0_1] : memref<8x256xf32, #tpu.memory_space<vmem>>, vector<8x256xf32>
    %cst = arith.constant dense<0xFF800000> : vector<256xf32>
    %4 = vector.multi_reduction <maximumf>, %3, %cst [0] : vector<8x256xf32> to vector<256xf32>
    %5 = vector.shape_cast %4 : vector<256xf32> to vector<1x256xf32>
    %c0_2 = arith.constant 0 : index
    %c0_3 = arith.constant 0 : index
    %6 = vector.load %arg3[%c0_2, %c0_3] : memref<1x256xf32, #tpu.memory_space<vmem>>, vector<1x256xf32>
    %c0_4 = arith.constant 0 : index
    %c0_5 = arith.constant 0 : index
    %7 = vector.load %arg4[%c0_4, %c0_5] : memref<1x256xf32, #tpu.memory_space<vmem>>, vector<1x256xf32>
    %cst_6 = arith.constant 0.000000e+00 : f32
    %8 = vector.broadcast %cst_6 : f32 to vector<1x256xf32>
    %9 = arith.maximumf %5, %8 : vector<1x256xf32>
    %10 = arith.mulf %5, %6 : vector<1x256xf32>
    %11 = arith.subf %9, %10 : vector<1x256xf32>
    %12 = math.absf %5 : vector<1x256xf32>
    %cst_7 = arith.constant 0.000000e+00 : f32
    %13 = vector.broadcast %cst_7 : f32 to vector<1x256xf32>
    %14 = arith.subf %13, %12 : vector<1x256xf32>
    %15 = math.exp %14 : vector<1x256xf32>
    %16 = math.log1p %15 : vector<1x256xf32>
    %17 = arith.addf %11, %16 : vector<1x256xf32>
    %c0_8 = arith.constant 0 : index
    %c0_9 = arith.constant 0 : index
    %18 = vector.load %arg6[%c0_8, %c0_9] : memref<1x256xf32, #tpu.memory_space<vmem>>, vector<1x256xf32>
    %19 = arith.mulf %7, %17 : vector<1x256xf32>
    %20 = arith.addf %18, %19 : vector<1x256xf32>
    %c0_10 = arith.constant 0 : index
    %c0_11 = arith.constant 0 : index
    %21 = vector.load %arg6[%c0_10, %c0_11] : memref<1x256xf32, #tpu.memory_space<vmem>>, vector<1x256xf32>
    tpu.vector_store %arg6[%c0_10, %c0_11], %20 {strides = array<i32>} : memref<1x256xf32, #tpu.memory_space<vmem>>, vector<1x256xf32>,
    %c0_i32_12 = arith.constant 0 : i32
    %22 = arith.cmpi eq, %arg1, %c0_i32_12 : i32
    %23 = arith.extui %22 : i1 to i32
    %c0_i32_13 = arith.constant 0 : i32
    %24 = arith.cmpi ne, %23, %c0_i32_13 : i32
    scf.if %24 {
      %c0_14 = arith.constant 0 : index
      %c0_15 = arith.constant 0 : index
      %25 = vector.load %arg6[%c0_14, %c0_15] : memref<1x256xf32, #tpu.memory_space<vmem>>, vector<1x256xf32>
      %26 = vector.shape_cast %25 : vector<1x256xf32> to vector<1x1x256xf32>
      %cst_16 = arith.constant dense<0.000000e+00> : vector<1xf32>
      %27 = vector.multi_reduction <add>, %26, %cst_16 [1, 2] : vector<1x1x256xf32> to vector<1xf32>
      %28 = vector.shape_cast %27 : vector<1xf32> to vector<1x1x1xf32>
      %29 = vector.extract %28[0, 0, 0] : f32 from vector<1x1x1xf32>
      %cst_17 = arith.constant 3.906250e-03 : f32
      %30 = arith.mulf %29, %cst_17 : f32
      %31 = vector.broadcast %30 : f32 to vector<8x128xf32>
      %c0_18 = arith.constant 0 : index
      %c0_19 = arith.constant 0 : index
      %32 = vector.load %arg5[%c0_18, %c0_19] : memref<8x128xf32, #tpu.memory_space<vmem>>, vector<8x128xf32>
      tpu.vector_store %arg5[%c0_18, %c0_19], %31 {strides = array<i32>} : memref<8x128xf32, #tpu.memory_space<vmem>>, vector<8x128xf32>,
    } else {
    }
    return
  }
  func.func @transform_0(%arg0: i32, %arg1: i32) -> (i32, i32) {
    %c1_i32 = arith.constant 1 : i32
    %0 = arith.muli %arg0, %c1_i32 : i32
    %1 = arith.addi %0, %arg1 : i32
    %c0_i32 = arith.constant 0 : i32
    %c0_i32_0 = arith.constant 0 : i32
    return %c0_i32, %1 : i32, i32
  }
  func.func @transform_1(%arg0: i32, %arg1: i32) -> (i32, i32) {
    %c1_i32 = arith.constant 1 : i32
    %0 = arith.muli %arg0, %c1_i32 : i32
    %1 = arith.addi %0, %arg1 : i32
    %c0_i32 = arith.constant 0 : i32
    %c0_i32_0 = arith.constant 0 : i32
    return %c0_i32, %1 : i32, i32
  }
  func.func @transform_2(%arg0: i32, %arg1: i32) -> (i32, i32) {
    %c1_i32 = arith.constant 1 : i32
    %0 = arith.muli %arg0, %c1_i32 : i32
    %1 = arith.addi %0, %arg1 : i32
    %c0_i32 = arith.constant 0 : i32
    %c0_i32_0 = arith.constant 0 : i32
    return %c0_i32, %1 : i32, i32
  }
  func.func @transform_3(%arg0: i32, %arg1: i32) -> (i32, i32) {
    %c0_i32 = arith.constant 0 : i32
    %c0_i32_0 = arith.constant 0 : i32
    return %c0_i32, %arg0 : i32, i32
  }
}

</mosaic_0001>

<bundles_post_ra>
// kernel: tpu_custom_call.1
= control target key start
LH: loop header
LB: loop body
LE: loop exit
PB: predicated region body
PF: predicated region fallthrough
CT: control target
= control target key end

     0   :  { %8 = vsyncpa [#allocation4], 0  ;;  %s1030_s0 = inlined_call_operand.hbm [shape: f32[8,512], index: 0, kind: input, shape index: {}]   ;;  %s1031_s1 = inlined_call_operand.hbm [shape: f32[1,512], index: 1, kind: input, shape index: {}]   ;;  %s1032_s2 = inlined_call_operand.vmem [shape: f32[1,512], index: 2, kind: input, shape index: {}]   ;;  %s1033_s3 = inlined_call_operand.hbm [shape: f32[8,256], index: 3, kind: output, shape index: {}]  }
   0x1   :  { %10 = vsyncpa [#allocation4 + $0x1], 0 }
   0x2   :  { %11 = vsyncpa [#allocation7], 0 }
   0x3   :  { %13 = vsyncpa [#allocation7 + $0x1], 0 }
   0x4   :  { %14 = vsyncpa [#allocation5], 0 }
   0x5   :  { %16 = vsyncpa [#allocation5 + $0x1], 0  ;;  %s799_s12 = smov 0   ;;  %s801_s13 = smov 0  }
   0x6   :  { %s803_s14 = smov 0   ;;  %s805_s15 = smov 0  }
   0x7   :  { %s807_s16 = smov 0   ;;  %s809_s17 = smov 0  }
   0x8 LB: > { %s526_s18 = sadd.s32 4294967295, %s772_s17   ;;  %s527_s19 = sadd.s32 4294967294, %s772_s17   ;;  %s772_s17 = sphi %s809_s17, %s22_s17   ;;  %s768_s16 = sphi %s807_s16, %s1055_s16   ;;  %s764_s15 = sphi %s805_s15, %s1054_s15   ;;  %s760_s14 = sphi %s803_s14, %s1053_s14   ;;  %s756_s13 = sphi %s801_s13, %s1052_s13   ;;  %s752_s12 = sphi %s799_s12, %s1051_s12  }
   0x9   : > { %s34_s20 = sadd.s32 1, %s768_s16  ;;  %s43_s21 = sadd.s32 1, %s760_s14 }
   0xa   : > { %p36_p0 = scmp.ge.s32.totalorder %s34_s20, 2  ;;  %p50_p1 = scmp.ne.s32.totalorder %s760_s14, %s756_s13 }
   0xb   : > { %p51_p2 = scmp.eq.s32.totalorder %s772_s17, 0  ;;  %p56_p3 = scmp.ne.s32.totalorder %s756_s13, %s752_s12 }
   0xc   : > { %s1057_s20 = smov (%p36_p0, %s34_s20), 0  ;;  %p57_p5 = scmp.eq.s32.totalorder %s526_s18, 0 }
   0xd   : > { %p840_p4 = por %p51_p2, %p50_p1  ;;  %s40_s23 = ssub.s32 %s768_s16, %s1057_s20 }
   0xe   : > { %p136_p6 = scmp.eq.s32.totalorder %s526_s18, 1  ;;  %p41_p7 = scmp.eq.s32.totalorder %s40_s23, 0 }
   0xf   : > { %p846_p8 = por %p57_p5, %p56_p3  ;;  %p142_p10 = scmp.eq.s32.totalorder %s527_s19, 1 }
  0x10   : > { %p850_p9 = por %p136_p6, %p50_p1  ;;  %p566_p13 = scmp.lt.s32.totalorder %s772_s17, 2 }
  0x11   : > { %s1037_s24 = scalar_select %p846_p8, 1, 0 }
  0x12   : > { %s1038_s25 = scalar_select %p850_p9, 1, 0 }
  0x13   : > { %s855_s26 = scalar_select %p41_p7, %s760_s14, %s43_s21  }
  0x14   : > { %p857_p11 = por %p142_p10, %p56_p3  ;;  %s864_s28 = sand.u32 1, %s760_s14  }
  0x15   : > { %s530_s29 = sshll.u32 %s864_s28, 4  ;;  %s545_s30 = sshll.u32 %s768_s16, 8 }
  0x16   : > { %s1039_s27 = scalar_select %p857_p11, 1, 0 }
  0x17   : > { %s871_s6 = scalar_lea.hbm %s1030_s0, %s545_s30  ;;  %s166_s7 = scalar_lea.vmem [#allocation3], %s530_s29 }
  0x18   : > { %s175_s8 = sshll.u32 %s166_s7, 4  ;;  %p877_p0 = pnand %p566_p13, %p840_p4  ;;  %s873_s8 = int_to_ptr.vmem [resolvable:$true] %s175_s8 }
  0x19   : > { %s163_s10 = scalar_lea.sflag [#allocation4], %s864_s28  ;;  %s626_s11 = scalar_lea.hbm %s871_s6, 256 }
  0x1a   : > { %p627_p3 = scmp.ne.s32.totalorder %s871_s6, %s626_s11  ;;  %p628_p5 = pneg %p877_p0 }
  0x1b   : > { %s631_s21 = scalar_lea.hbm %s1030_s0, 512  ;;  %p632_p4 = scmp.lt.u32.totalorder %s871_s6, %s1030_s0 }
  0x1c   : > { %p629_p6 = pnand %p628_p5, %p627_p3  ;;  %p633_p10 = scmp.lt.u32.totalorder %s631_s21, %s626_s11 }
  0x1d   : > { %p635_p12 = scmp.lt.u32.totalorder %s626_s11, %s871_s6 }
  0x1e   : > { %p630_p7 = pneg %p629_p6  ;;  %p634_p13 = por %p633_p10, %p632_p4 }
  0x20   : > { %p636_p1 = por %p635_p12, %p634_p13 }
  0x22   : > { %p637_p2 = pnand %p636_p1, %p630_p7 }
  0x24   : > { %640 = shalt.err (!%p637_p2)
}
  0x25   : > { %s641_s29 = scalar_lea.vmem %s873_s8, 256  ;;  %s774_s30 = smov [#allocation3]  }
  0x26   : > { %p642_p3 = scmp.ne.s32.totalorder %s873_s8, %s641_s29  ;;  %s646_s4 = sshll.u32 %s774_s30, 4  ;;  %s647_s4 = int_to_ptr.vmem [resolvable:$false] %s646_s4 }
  0x27   : > { %s648_s5 = scalar_lea.vmem %s647_s4, 512  ;;  %p649_p9 = scmp.lt.s32.totalorder %s873_s8, %s647_s4 }
  0x28   : > { %p644_p6 = pnand %p642_p3, %p628_p5  ;;  %p650_p4 = scmp.lt.s32.totalorder %s648_s5, %s641_s29 }
  0x2a   : > { %p645_p11 = pneg %p644_p6  ;;  %p651_p10 = por %p650_p4, %p649_p9 }
  0x2c   : > { %p652_p12 = pnand %p651_p10, %p645_p11 }
  0x2e   : > { %655 = shalt.err (!%p652_p12)
}
  0x2f   : > { %558 = dma.hbm_to_vmem [thread:$0]  (!%p877_p0), %s871_s6, 256, %s873_s8, %s163_s10  }
  0x30   : > { %p1041_p1 = scmp.lt.s32.totalorder %s772_s17, 3  ;;  %p1042_p2 = scmp.ge.s32.totalorder %s772_s17, 1 }
  0x31   : > { %s533_s11 = sshll.u32 %s864_s28, 1  ;;  %s546_s18 = sshll.u32 %s768_s16, 5 }
  0x32   : > { %p913_p7 = pnand %p1042_p2, %p1041_p1  ;;  %s922_s22 = scalar_lea.hbm %s1031_s1, %s546_s18 }
  0x33   : > { %s186_s23 = scalar_lea.vmem [#allocation6], %s533_s11  ;;  %s183_s6 = scalar_lea.sflag [#allocation7], %s864_s28 }
  0x34   : > { %s1043_s7 = scalar_select %p913_p7, 1, 0 }
  0x35   : > { %s195_s29 = sshll.u32 %s186_s23, 4  ;;  %s656_s8 = scalar_lea.hbm %s922_s22, 32  ;;  %s196_s29 = int_to_ptr.vmem [resolvable:$true] %s195_s29 }
  0x36   : > { %p657_p9 = scmp.ne.s32.totalorder %s922_s22, %s656_s8  ;;  %s661_s4 = scalar_lea.hbm %s1031_s1, 64 }
  0x37   : > { %p662_p3 = scmp.lt.u32.totalorder %s922_s22, %s1031_s1  ;;  %p663_p6 = scmp.lt.u32.totalorder %s661_s4, %s656_s8 }
  0x38   : > { %p659_p11 = pnand %p657_p9, %p628_p5  ;;  %p665_p10 = scmp.lt.u32.totalorder %s656_s8, %s922_s22 }
  0x39   : > { %p664_p4 = por %p663_p6, %p662_p3 }
  0x3a   : > { %p660_p13 = pneg %p659_p11 }
  0x3b   : > { %p666_p12 = por %p665_p10, %p664_p4 }
  0x3d   : > { %p667_p1 = pnand %p666_p12, %p660_p13 }
  0x3f   : > { %670 = shalt.err (!%p667_p1)
}
  0x40   : > { %s671_s28 = scalar_lea.vmem %s196_s29, 32  ;;  %s775_s11 = smov [#allocation6]  }
  0x41   : > { %p672_p2 = scmp.ne.s32.totalorder %s196_s29, %s671_s28  ;;  %s676_s19 = sshll.u32 %s775_s11, 4  ;;  %s677_s19 = int_to_ptr.vmem [resolvable:$false] %s676_s19 }
  0x42   : > { %s678_s21 = scalar_lea.vmem %s677_s19, 64  ;;  %p679_p8 = scmp.lt.s32.totalorder %s196_s29, %s677_s19 }
  0x43   : > { %p674_p9 = pnand %p672_p2, %p628_p5  ;;  %p680_p7 = scmp.lt.s32.totalorder %s678_s21, %s671_s28 }
  0x45   : > { %p675_p11 = pneg %p674_p9  ;;  %p681_p3 = por %p680_p7, %p679_p8 }
  0x47   : > { %p682_p6 = pnand %p681_p3, %p675_p11 }
  0x49   : > { %685 = shalt.err (!%p682_p6)
}
  0x4a   : > { %561 = dma.hbm_to_vmem [thread:$0]  (!%p877_p0), %s922_s22, 32, %s196_s29, %s183_s6  }
  0x4b   : > { %p1044_p13 = scmp.ne.s32.totalorder %s1043_s7, 0 }
  0x4c   : > { %s947_s23 = sand.u32 (!%p1044_p13), 1, %s756_s13   ;;  %p1045_p5 = scmp.ne.s32.totalorder (!%p1044_p13), %s1037_s24, 0 }
  0x4d   : > { %214 = sbr.rel (%p1044_p13) target bundleno = 381 (0x17d), region = 32  ;;  %s537_s8 = sshll.u32 (!%p1044_p13), %s947_s23, 4 }
  0x4e   : > { %s217_s10 = scalar_lea.sflag (!%p1044_p13), [#allocation4], %s947_s23  ;;  %s220_s30 = scalar_lea.vmem (!%p1044_p13), [#allocation3], %s537_s8 }
  0x54   : > { %739 = dma.done.wait (%p1045_p5), %s217_s10, 256  }
  0x55   : > { %741 = vsyncadd (%p1045_p5), %s217_s10, 4294967040  ;;  %s538_s9 = sshll.u32 %s947_s23, 1  ;;  %s226_s7 = scalar_lea.sflag [#allocation7], %s947_s23 }
  0x56   : > { %s957_s22 = scalar_lea.vmem [#allocation6], %s538_s9 }
  0x57   : > { %743 = dma.done.wait (%p1045_p5), %s226_s7, 32  }
  0x58   : > { %745 = vsyncadd (%p1045_p5), %s226_s7, 4294967264  ;;  %v277_v0 = vlaneseq  ;;  %v776_v2 = vmov 0.0   ;;  %v282_v3 = vld [vmem:[%s220_s30] sm:$0xff]  ;;  %v283_v4 = vld [vmem:[%s220_s30 + $0x8] sm:$0xff]  ;;  %s540_s24 = sshll.u32 %s764_s15, 1  ;;  %vm384_vm3 = vcmask 1040384  }
  0x59   : > { %v284_v5 = vrot.slane %v282_v3, 4  ;;  %v290_v6 = vrot.slane %v283_v4, 4  ;;  %v296_v28 = vld [vmem:[%s957_s22] sm:$0x3]  ;;  %v777_v43 = vmov 1966171168  }
  0x5a   : > { %vm963_vm0 = vcmp.lt.s32.totalorder %v277_v0, 256  ;;  %v302_v23 = vshrl.u32 %v277_v0, 7  ;;  %v348_v44 = vunpack.c.l.s4 %v777_v43  ;;  %p268_p8 = scmp.lt.s32.totalorder %s540_s24, 3  ;;  %s539_s5 = sshll.u32 %s947_s23, 3 }
  0x5b   : > { %281 = vst.msk [vmem:[#allocation2] sm:$0x3] %vm963_vm0, %v776_v2  ;;  %v285_v7 = vmax.f32 %v282_v3, %v284_v5  ;;  %v291_v8 = vmax.f32 %v283_v4, %v290_v6  ;;  %s261_s18 = scalar_lea.vmem [#allocation8], %s539_s5  ;;  %s542_s11 = sshll.u32 %s764_s15, 7 }
  0x5c   : > { %v303_v26 = vsub.s32 0, %v302_v23  ;;  %v307_v29 = vsub.s32 1, %v302_v23  ;;  %v349_v52 = vunpack.c.0.s8 %v348_v44  ;;  %s1059_s24 = smov (!%p268_p8, %s540_s24), 3  ;;  %s414_s28 = sshll.u32 %s261_s18, 4  ;;  %s983_s28 = int_to_ptr.vmem [resolvable:$true] %s414_s28 }
  0x5d   : > { %v286_v9 = vrot.slane %v285_v7, 2  ;;  %v292_v10 = vrot.slane %v291_v8, 2  ;;  %s270_s4 = scalar_lea.vmem %s1032_s2, %s1059_s24  ;;  %s981_s30 = scalar_lea.hbm %s1033_s3, %s542_s11 }
  0x5e   : > { %v304_v32 = vrot.slane %v296_v28, %v303_v26  ;;  %v308_v34 = vrot.slane %v296_v28, %v307_v29  ;;  %v352_v58 = vsub.s32 %v349_v52, %v302_v23  ;;  %v297_v61 = vld [vmem:[%s270_s4] sm:$0x3]  ;;  %s401_s9 = scalar_lea.sflag [#allocation5], %s947_s23  ;;  %s686_s7 = scalar_lea.vmem %s983_s28, 128 }
  0x5f   : > { %v287_v11 = vmax.f32 %v285_v7, %v286_v9  ;;  %v293_v12 = vmax.f32 %v291_v8, %v292_v10  ;;  %p687_p0 = scmp.ne.s32.totalorder %s983_s28, %s686_s7  ;;  %p1048_p7 = scmp.ne.s32.totalorder %s1038_s25, 0 }
  0x60   : > { %s778_s15 = smov [#allocation8]  }
  0x61   : > { %v288_v13 = vrot.slane %v287_v11, 1  ;;  %v294_v14 = vrot.slane %v293_v12, 1  ;;  %p688_p4 = pnand %p687_p0, %p1048_p7  ;;  %s690_s22 = sshll.u32 %s778_s15, 4  ;;  %s691_s22 = int_to_ptr.vmem [resolvable:$false] %s690_s22 }
  0x62   : > { %v343_v63 = vld [vmem:[#allocation2] sm:$0x3]  ;;  %s692_s24 = scalar_lea.vmem %s691_s22, 256  ;;  %p693_p12 = scmp.lt.s32.totalorder %s983_s28, %s691_s22 }
  0x63   : > { %v289_v15 = vmax.f32 %v287_v11, %v288_v13  ;;  %v295_v16 = vmax.f32 %v293_v12, %v294_v14  ;;  %p689_p10 = pneg %p688_p4  ;;  %p694_p1 = scmp.lt.s32.totalorder %s692_s24, %s686_s7 }
  0x65   : > { %v315_v17 = vand.u32 2147483647, %v289_v15  ;;  %v316_v18 = vand.u32 2147483647, %v295_v16  ;;  %v298_v36 = vmax.f32 %v289_v15, 0.0  ;;  %v311_v37 = vmul.f32 %v304_v32, %v289_v15  ;;  %p695_p2 = por %p694_p1, %p693_p12 }
  0x66   : > { %v299_v40 = vmax.f32 %v295_v16, 0.0  ;;  %v312_v41 = vmul.f32 %v308_v34, %v295_v16 }
  0x67   : > { %v317_v19 = vsub.f32 0.0, %v315_v17  ;;  %v318_v20 = vsub.f32 0.0, %v316_v18  ;;  %v313_v47 = vsub.f32 %v298_v36, %v311_v37  ;;  %p696_p9 = pnand %p695_p2, %p689_p10 }
  0x68   : > { %v314_v50 = vsub.f32 %v299_v40, %v312_v41 }
  0x69   : > { %v319_v21 = vmul.f32 1.442695, %v317_v19  ;;  %v321_v22 = vmul.f32 1.442695, %v318_v20 }
  0x6b   : > { %618 = vpow2.f32 %v319_v21 }
  0x6c   : > { %620 = vpow2.f32 %v321_v22 }
  0x75   : > { %v619_v24 = vpop.eup %618 }
  0x76   : > { %v621_v25 = vpop.eup %620  ;;  %v323_v27 = vadd.f32 1.0, %v619_v24  ;;  %v326_v31 = vmul.f32 -0.5, %v619_v24  ;;  %v329_v38 = vand.u32 2147483647, %v619_v24 }
  0x77   : > { %v332_v30 = vadd.f32 1.0, %v621_v25  ;;  %v335_v33 = vmul.f32 -0.5, %v621_v25  ;;  %v338_v42 = vand.u32 2147483647, %v621_v25 }
  0x78   : > { %622 = vlog2.f32 %v323_v27  ;;  %v327_v35 = vadd.f32 1.0, %v326_v31  ;;  %vm330_vm1 = vcmp.lt.f32.partialorder %v329_v38, 0.0004427343 }
  0x79   : > { %624 = vlog2.f32 %v332_v30  ;;  %v336_v39 = vadd.f32 1.0, %v335_v33  ;;  %vm339_vm2 = vcmp.lt.f32.partialorder %v338_v42, 0.0004427343 }
  0x7a   : > { %v328_v45 = vmul.f32 %v619_v24, %v327_v35 }
  0x7b   : > { %v337_v48 = vmul.f32 %v621_v25, %v336_v39 }
  0x82   : > { %v623_v46 = vpop.eup %622 }
  0x83   : > { %v625_v49 = vpop.eup %624  ;;  %v325_v51 = vmul.f32 0.6931472, %v623_v46 }
  0x84   : > { %v334_v53 = vmul.f32 0.6931472, %v625_v49 }
  0x85   : > { %v331_v54 = vsel %vm330_vm1, %v328_v45, %v325_v51 }
  0x86   : > { %v340_v55 = vsel %vm339_vm2, %v337_v48, %v334_v53  ;;  %v341_v56 = vadd.f32 %v331_v54, %v313_v47 }
  0x87   : > { %v342_v57 = vadd.f32 %v340_v55, %v314_v50 }
  0x89   : > { %v346_v59 = vcombine.low %v341_v56, %v342_v57 }
  0x8b   : > { %v353_v60 = vrot.slane %v346_v59, %v352_v58 }
  0x8d   : > { %v360_v62 = vrot.slane %v353_v60, %v352_v58 }
  0x8f   : > { %v362_v0 = vmul.f32 %v360_v62, %v297_v61 }
  0x91   : > { %v363_v2 = vadd.f32 %v362_v0, %v343_v63 }
  0x93   : > { %368 = vst.msk [vmem:[#allocation2] sm:$0x3] %vm963_vm0, %v363_v2 }
  0x9a   : > { %v372_v3 = vld [vmem:[#allocation2] sm:$0x3] }
  0x9b   : > { %v377_v4 = vrot.slane %v372_v3, %v303_v26  ;;  %v381_v5 = vrot.slane %v372_v3, %v307_v29 }
  0x9d   : > { %v385_v6 = vsel %vm384_vm3, %v377_v4, 0.0  ;;  %v386_v7 = vsel %vm384_vm3, %v381_v5, 0.0 }
  0x9e   : > { %v387_v8 = vadd.f32 %v386_v7, %v385_v6 }
  0xa0   : > { %388 = vadd.xlane.f32.xlu0 %v387_v8 }
 0x12d   : > { %v389_v9 = vpop.xlane.xlu0 %388 }
 0x12e   : > { %v390_v10 = vrot.slane %v389_v9, 4 }
 0x130   : > { %v391_v11 = vadd.f32 %v390_v10, %v389_v9 }
 0x132   : > { %v392_v12 = vrot.slane %v391_v11, 2 }
 0x134   : > { %v393_v13 = vadd.f32 %v392_v12, %v391_v11 }
 0x136   : > { %v394_v14 = vrot.slane %v393_v13, 1 }
 0x138   : > { %v395_v1 = vadd.f32 %v394_v14, %v393_v13 }
 0x13a   : > { %547 = vpush %v395_v1 }
 0x16b   : > { %s548_s19 = spop %547 }
 0x16c   : > { %s397_s21 = smul.f32 0.00390625, %s548_s19 }
 0x16e   : > { %v398_v15 = vstv %s397_s21 }
 0x16f   : > { %399 = vst [vmem:[%s261_s18] sm:$0xff] %v398_v15 }
 0x170   : > { %699 = shalt.err (!%p696_p9)
}
 0x171   : > { %s700_s23 = scalar_lea.hbm %s981_s30, 128  ;;  %s704_s4 = scalar_lea.hbm %s1033_s3, 256 }
 0x172   : > { %p701_p11 = scmp.ne.s32.totalorder %s981_s30, %s700_s23  ;;  %p705_p13 = scmp.lt.u32.totalorder %s981_s30, %s1033_s3 }
 0x173   : > { %p706_p5 = scmp.lt.u32.totalorder %s704_s4, %s700_s23  ;;  %p708_p0 = scmp.lt.u32.totalorder %s700_s23, %s981_s30 }
 0x174   : > { %p702_p3 = pnand %p701_p11, %p1048_p7 }
 0x175   : > { %p707_p8 = por %p706_p5, %p705_p13 }
 0x176   : > { %p703_p6 = pneg %p702_p3 }
 0x177   : > { %p709_p4 = por %p708_p0, %p707_p8 }
 0x179   : > { %p710_p10 = pnand %p709_p4, %p703_p6 }
 0x17b   : > { %713 = shalt.err (!%p710_p10)
}
 0x17c   : > { %553 = dma.vmem_to_hbm [thread:$0]  (%p1048_p7), %s983_s28, 128, %s981_s30, %s401_s9  }
 0x17d PF: > { %s426_s11 = sand.u32 1, %s752_s12   ;;  %p1049_p12 = scmp.ne.s32.totalorder %s1039_s27, 0 }
 0x17e   : > { %p1050_p1 = scmp.ge.s32.totalorder %s772_s17, 2  ;;  %s427_s19 = scalar_lea.sflag [#allocation5], %s426_s11 }
 0x180   : > { %p563_p2 = pnand %p1050_p1, %p1049_p12 }
 0x182   : > { %747 = dma.done.wait (!%p563_p2), %s427_s19, 128  }
 0x183   : > { %749 = vsyncadd (!%p563_p2), %s427_s19, 4294967168  ;;  %s22_s17 = sadd.s32 1, %s772_s17   ;;  %s1051_s12 = smov %s756_s13 }
 0x184   : > { %p19_p9 = scmp.ge.s32.totalorder %s22_s17, 4   ;;  %s1052_s13 = smov %s760_s14 }
 0x185   : > { %s1053_s14 = smov %s855_s26  ;;  %s1054_s15 = smov %s768_s16 }
 0x186   : > { %s1055_s16 = smov %s1057_s20  ;;  %21 = sbr.rel (!%p19_p9) target bundleno = 8 (0x8), region = 101 }
 0x18d   :  { %432 = vsyncpa [#allocation4], 1 }
 0x18e   :  { %434 = vsyncpa [#allocation4 + $0x1], 1 }
 0x18f   :  { %435 = vsyncpa [#allocation7], 1 }
 0x190   :  { %437 = vsyncpa [#allocation7 + $0x1], 1 }
 0x191   :  { %438 = vsyncpa [#allocation5], 1 }
 0x192   :  { %440 = vsyncpa [#allocation5 + $0x1], 1 }

</bundles_post_ra>
